<compile_context>
chip_gen: v7x
topology: tpu7x:2x2x1
jax: 0.10.0
libtpu: 0.0.40
codegen_flags: <defaults>
</compile_context>

<pallas_src>
import math

import jax
import jax.numpy as jnp
from jax.experimental import pallas as pl
from jax.experimental.pallas import tpu as pltpu


def phi_kernel(s_ref, w1_ref, b1_ref, w2_ref, b2_ref, w3_ref, b3_ref, o_ref):
    """Fused 3-layer MLP forward: relu(x@W1+b1) -> relu(.@W2+b2) -> .@W3+b3."""
    x = s_ref[...]                                                      # [TB, state_dim]
    h1 = jnp.dot(x, w1_ref[...], preferred_element_type=jnp.float32)   # [TB, H]
    h1 = jnp.maximum(h1 + b1_ref[...], 0.0)
    h2 = jnp.dot(h1, w2_ref[...], preferred_element_type=jnp.float32)  # [TB, H]
    h2 = jnp.maximum(h2 + b2_ref[...], 0.0)
    o = jnp.dot(h2, w3_ref[...], preferred_element_type=jnp.float32)   # [TB, skill_dim]
    o_ref[...] = (o + b3_ref[...]).astype(o_ref.dtype)


def _round_up(x, m):
    return ((x + m - 1) // m) * m


def phi_forward(state, params, *, skill_dim, tile_b=2048):
    """JAX wrapper reproducing Phi.forward semantics.

    state:  [B, num_inputs + skill_dim] float32 (full state incl. skill columns)
    params: (w1 [num_inputs,H], b1 [H], w2 [H,H], b2 [H], w3 [H,skill_dim], b3 [skill_dim])
    returns [B, skill_dim] float32
    """
    w1, b1, w2, b2, w3, b3 = params
    num_inputs, hidden = w1.shape
    B, state_dim = state.shape
    assert state_dim == num_inputs + skill_dim

    state = state.astype(jnp.float32)

    # Fold the `state[:, :-skill_dim]` slice into the first matmul: append
    # skill_dim zero rows to W1 so the trailing skill columns contribute 0.
    w1_pad = jnp.concatenate(
        [w1.astype(jnp.float32), jnp.zeros((skill_dim, hidden), jnp.float32)], axis=0
    )                                                                    # [state_dim, H]

    b1_2d = b1.reshape(1, hidden).astype(jnp.float32)
    b2_2d = b2.reshape(1, hidden).astype(jnp.float32)
    w3_f = w3.astype(jnp.float32)                                        # [H, skill_dim]
    b3_2d = b3.reshape(1, skill_dim).astype(jnp.float32)

    # Batch tiling: TB rows per grid step (multiple of 8).  Cap TB so that
    # medium/large batches produce >= 2 grid steps (v7x: 2 TensorCores share
    # the "parallel" axis).  No batch padding: grid = cdiv(B, TB) and Pallas
    # discards out-of-bounds rows of the final block on writeback.
    tb = _round_up(min(tile_b, _round_up(B, 8)), 8)
    if B >= 16:
        tb = min(tb, _round_up(pl.cdiv(B, 2), 8))
    grid = (pl.cdiv(B, tb),)

    # Conservative per-step VMEM estimate (lane-padded f32 rows):
    #   2x double-buffered state tile + 2x output tile + h1 + h2, plus weights.
    vmem_est = 6 * tb * 128 * 4 + (2 << 20)
    vmem_limit = int(min(max(vmem_est, 32 << 20), 48 << 20))

    out = pl.pallas_call(
        phi_kernel,
        out_shape=jax.ShapeDtypeStruct((B, skill_dim), jnp.float32),
        grid=grid,
        in_specs=[
            pl.BlockSpec((tb, state_dim), lambda i: (i, 0)),        # state tile
            pl.BlockSpec((state_dim, hidden), lambda i: (0, 0)),    # W1 (resident)
            pl.BlockSpec((1, hidden), lambda i: (0, 0)),            # b1
            pl.BlockSpec((hidden, hidden), lambda i: (0, 0)),       # W2
            pl.BlockSpec((1, hidden), lambda i: (0, 0)),            # b2
            pl.BlockSpec((hidden, skill_dim), lambda i: (0, 0)),    # W3
            pl.BlockSpec((1, skill_dim), lambda i: (0, 0)),         # b3
        ],
        out_specs=pl.BlockSpec((tb, skill_dim), lambda i: (i, 0)),
        compiler_params=pltpu.CompilerParams(
            dimension_semantics=("parallel",),
            vmem_limit_bytes=vmem_limit,
        ),
    )(state, w1_pad, b1_2d, w2, b2_2d, w3_f, b3_2d)

    return out


def init_phi_params(key, num_inputs, hidden_dim, skill_dim):
    """Matches weights_init_: xavier_uniform(gain=1) weights, zero biases.

    Weights stored as [in, out] (transposed vs torch nn.Linear) so the kernel
    does x @ W directly.
    """
    def xavier(k, fan_in, fan_out):
        bound = math.sqrt(6.0 / (fan_in + fan_out))
        return jax.random.uniform(
            k, (fan_in, fan_out), dtype=jnp.float32, minval=-bound, maxval=bound
        )

    k1, k2, k3 = jax.random.split(key, 3)
    w1 = xavier(k1, num_inputs, hidden_dim)
    b1 = jnp.zeros((hidden_dim,), jnp.float32)
    w2 = xavier(k2, hidden_dim, hidden_dim)
    b2 = jnp.zeros((hidden_dim,), jnp.float32)
    w3 = xavier(k3, hidden_dim, skill_dim)
    b3 = jnp.zeros((skill_dim,), jnp.float32)
    return (w1, b1, w2, b2, w3, b3)


def phi_forward_ref(state, params, *, skill_dim):
    """Pure-JAX reference for correctness checking."""
    w1, b1, w2, b2, w3, b3 = params
    x = state[:, : state.shape[1] - skill_dim].astype(jnp.float32)
    h1 = jnp.maximum(x @ w1 + b1, 0.0)
    h2 = jnp.maximum(h1 @ w2 + b2, 0.0)
    return h2 @ w3 + b3


if __name__ == "__main__":
    # Shapes consistent with the module: args.hidden_size=32, args.skill_dim=8,
    # num_inputs=32  =>  state has num_inputs + skill_dim = 40 columns.
    num_inputs = 32
    hidden_dim = 32
    skill_dim = 8

    key = jax.random.PRNGKey(0)
    k_state, k_state2, k_params = jax.random.split(key, 3)
    params = init_phi_params(k_params, num_inputs, hidden_dim, skill_dim)

    fwd = jax.jit(phi_forward, static_argnames=("skill_dim", "tile_b"))

    # Case 1: batched call exercising the tiled "parallel" batch grid
    # (B=256 -> tb=128, grid=(2,): both v7x TensorCores get work).
    B1 = 256
    state1 = jax.random.normal(k_state, (B1, num_inputs + skill_dim), jnp.float32)
    out1 = jax.block_until_ready(fwd(state1, params, skill_dim=skill_dim))
    ref1 = phi_forward_ref(state1, params, skill_dim=skill_dim)
    assert out1.shape == (B1, skill_dim)
    assert jnp.allclose(out1, ref1, atol=1e-5, rtol=1e-5), "mismatch vs reference (B=256)"

    # Case 2: small ragged batch exercising the ragged-final-block path
    # (B=10 -> tb=8, grid=(2,), OOB rows of the last block dropped on writeback).
    B2 = 10
    state2 = jax.random.normal(k_state2, (B2, num_inputs + skill_dim), jnp.float32)
    out2 = jax.block_until_ready(fwd(state2, params, skill_dim=skill_dim))
    ref2 = phi_forward_ref(state2, params, skill_dim=skill_dim)
    assert out2.shape == (B2, skill_dim)
    assert jnp.allclose(out2, ref2, atol=1e-5, rtol=1e-5), "mismatch vs reference (B=10)"

    print("KERNEL_OK")
</pallas_src>

<mosaic_0001>
module attributes {stable_mosaic.version = 11 : i64} {
  func.func @phi_kernel(%arg0: i32, %arg1: memref<128x40xf32, #tpu.memory_space<vmem>>, %arg2: memref<40x32xf32, #tpu.memory_space<vmem>>, %arg3: memref<1x32xf32, #tpu.memory_space<vmem>>, %arg4: memref<32x32xf32, #tpu.memory_space<vmem>>, %arg5: memref<1x32xf32, #tpu.memory_space<vmem>>, %arg6: memref<32x8xf32, #tpu.memory_space<vmem>>, %arg7: memref<1x8xf32, #tpu.memory_space<vmem>>, %arg8: memref<128x8xf32, #tpu.memory_space<vmem>>) attributes {dimension_semantics = [#tpu.dimension_semantics<parallel>], iteration_bounds = array<i64: 2>, scalar_prefetch = 0 : i64, scratch_operands = 0 : i64, tpu.core_type = #tpu.core_type<tc>, window_params = [{transform_indices = @transform_0, window_bounds = array<i64: 128, 40>}, {pipeline_mode = #tpu.pipeline_mode<synchronous>, transform_indices = @transform_1, window_bounds = array<i64: 40, 32>}, {pipeline_mode = #tpu.pipeline_mode<synchronous>, transform_indices = @transform_2, window_bounds = array<i64: 1, 32>}, {pipeline_mode = #tpu.pipeline_mode<synchronous>, transform_indices = @transform_3, window_bounds = array<i64: 32, 32>}, {pipeline_mode = #tpu.pipeline_mode<synchronous>, transform_indices = @transform_4, window_bounds = array<i64: 1, 32>}, {pipeline_mode = #tpu.pipeline_mode<synchronous>, transform_indices = @transform_5, window_bounds = array<i64: 32, 8>}, {pipeline_mode = #tpu.pipeline_mode<synchronous>, transform_indices = @transform_6, window_bounds = array<i64: 1, 8>}, {transform_indices = @transform_7, window_bounds = array<i64: 128, 8>}]} {
    %c0 = arith.constant 0 : index
    %c0_0 = arith.constant 0 : index
    %0 = vector.load %arg1[%c0, %c0_0] : memref<128x40xf32, #tpu.memory_space<vmem>>, vector<128x40xf32>
    %c0_1 = arith.constant 0 : index
    %c0_2 = arith.constant 0 : index
    %1 = vector.load %arg2[%c0_1, %c0_2] : memref<40x32xf32, #tpu.memory_space<vmem>>, vector<40x32xf32>
    %cst = arith.constant dense<0.000000e+00> : vector<128x32xf32>
    %2 = tpu.matmul %0, %1, %cst {dimension_numbers = #tpu.dot_dimension_numbers<[1], [0], [0], [1], [0, 0, 1, 1], [], []>} : vector<128x40xf32>, vector<40x32xf32>, vector<128x32xf32> -> vector<128x32xf32>
    %c0_3 = arith.constant 0 : index
    %c0_4 = arith.constant 0 : index
    %3 = vector.load %arg3[%c0_3, %c0_4] : memref<1x32xf32, #tpu.memory_space<vmem>>, vector<1x32xf32>
    %4 = vector.broadcast %3 : vector<1x32xf32> to vector<128x32xf32>
    %5 = arith.addf %2, %4 : vector<128x32xf32>
    %cst_5 = arith.constant 0.000000e+00 : f32
    %6 = vector.broadcast %cst_5 : f32 to vector<128x32xf32>
    %7 = arith.maximumf %5, %6 : vector<128x32xf32>
    %c0_6 = arith.constant 0 : index
    %c0_7 = arith.constant 0 : index
    %8 = vector.load %arg4[%c0_6, %c0_7] : memref<32x32xf32, #tpu.memory_space<vmem>>, vector<32x32xf32>
    %cst_8 = arith.constant dense<0.000000e+00> : vector<128x32xf32>
    %9 = tpu.matmul %7, %8, %cst_8 {dimension_numbers = #tpu.dot_dimension_numbers<[1], [0], [0], [1], [0, 0, 1, 1], [], []>} : vector<128x32xf32>, vector<32x32xf32>, vector<128x32xf32> -> vector<128x32xf32>
    %c0_9 = arith.constant 0 : index
    %c0_10 = arith.constant 0 : index
    %10 = vector.load %arg5[%c0_9, %c0_10] : memref<1x32xf32, #tpu.memory_space<vmem>>, vector<1x32xf32>
    %11 = vector.broadcast %10 : vector<1x32xf32> to vector<128x32xf32>
    %12 = arith.addf %9, %11 : vector<128x32xf32>
    %cst_11 = arith.constant 0.000000e+00 : f32
    %13 = vector.broadcast %cst_11 : f32 to vector<128x32xf32>
    %14 = arith.maximumf %12, %13 : vector<128x32xf32>
    %c0_12 = arith.constant 0 : index
    %c0_13 = arith.constant 0 : index
    %15 = vector.load %arg6[%c0_12, %c0_13] : memref<32x8xf32, #tpu.memory_space<vmem>>, vector<32x8xf32>
    %cst_14 = arith.constant dense<0.000000e+00> : vector<128x8xf32>
    %16 = tpu.matmul %14, %15, %cst_14 {dimension_numbers = #tpu.dot_dimension_numbers<[1], [0], [0], [1], [0, 0, 1, 1], [], []>} : vector<128x32xf32>, vector<32x8xf32>, vector<128x8xf32> -> vector<128x8xf32>
    %c0_15 = arith.constant 0 : index
    %c0_16 = arith.constant 0 : index
    %17 = vector.load %arg7[%c0_15, %c0_16] : memref<1x8xf32, #tpu.memory_space<vmem>>, vector<1x8xf32>
    %18 = vector.broadcast %17 : vector<1x8xf32> to vector<128x8xf32>
    %19 = arith.addf %16, %18 : vector<128x8xf32>
    %c0_17 = arith.constant 0 : index
    %c0_18 = arith.constant 0 : index
    %20 = vector.load %arg8[%c0_17, %c0_18] : memref<128x8xf32, #tpu.memory_space<vmem>>, vector<128x8xf32>
    tpu.vector_store %arg8[%c0_17, %c0_18], %19 {strides = array<i32>} : memref<128x8xf32, #tpu.memory_space<vmem>>, vector<128x8xf32>,
    return
  }
  func.func @transform_0(%arg0: i32) -> (i32, i32) {
    %c0_i32 = arith.constant 0 : i32
    %c0_i32_0 = arith.constant 0 : i32
    return %arg0, %c0_i32 : i32, i32
  }
  func.func @transform_1(%arg0: i32) -> (i32, i32) {
    %c0_i32 = arith.constant 0 : i32
    %c0_i32_0 = arith.constant 0 : i32
    %c0_i32_1 = arith.constant 0 : i32
    return %c0_i32, %c0_i32_0 : i32, i32
  }
  func.func @transform_2(%arg0: i32) -> (i32, i32) {
    %c0_i32 = arith.constant 0 : i32
    %c0_i32_0 = arith.constant 0 : i32
    %c0_i32_1 = arith.constant 0 : i32
    return %c0_i32, %c0_i32_0 : i32, i32
  }
  func.func @transform_3(%arg0: i32) -> (i32, i32) {
    %c0_i32 = arith.constant 0 : i32
    %c0_i32_0 = arith.constant 0 : i32
    %c0_i32_1 = arith.constant 0 : i32
    return %c0_i32, %c0_i32_0 : i32, i32
  }
  func.func @transform_4(%arg0: i32) -> (i32, i32) {
    %c0_i32 = arith.constant 0 : i32
    %c0_i32_0 = arith.constant 0 : i32
    %c0_i32_1 = arith.constant 0 : i32
    return %c0_i32, %c0_i32_0 : i32, i32
  }
  func.func @transform_5(%arg0: i32) -> (i32, i32) {
    %c0_i32 = arith.constant 0 : i32
    %c0_i32_0 = arith.constant 0 : i32
    %c0_i32_1 = arith.constant 0 : i32
    return %c0_i32, %c0_i32_0 : i32, i32
  }
  func.func @transform_6(%arg0: i32) -> (i32, i32) {
    %c0_i32 = arith.constant 0 : i32
    %c0_i32_0 = arith.constant 0 : i32
    %c0_i32_1 = arith.constant 0 : i32
    return %c0_i32, %c0_i32_0 : i32, i32
  }
  func.func @transform_7(%arg0: i32) -> (i32, i32) {
    %c0_i32 = arith.constant 0 : i32
    %c0_i32_0 = arith.constant 0 : i32
    return %arg0, %c0_i32 : i32, i32
  }
}

</mosaic_0001>

<bundles_post_ra>
// kernel: phi_forward.1
= control target key start
LH: loop header
LB: loop body
LE: loop exit
PB: predicated region body
PF: predicated region fallthrough
CT: control target
= control target key end

     0   :  { %s1323_s24 = smov 0   ;;  %s1513_s0 = inlined_call_operand.vmem [shape: f32[256,40], index: 0, kind: input, shape index: {}]   ;;  %s1514_s1 = inlined_call_operand.vmem [shape: f32[40,32], index: 1, kind: input, shape index: {}]   ;;  %s1515_s2 = inlined_call_operand.vmem [shape: f32[1,32], index: 2, kind: input, shape index: {}]   ;;  %s1516_s3 = inlined_call_operand.vmem [shape: f32[32,32], index: 3, kind: input, shape index: {}]   ;;  %s1517_s4 = inlined_call_operand.vmem [shape: f32[1,32], index: 4, kind: input, shape index: {}]   ;;  %s1518_s5 = inlined_call_operand.vmem [shape: f32[32,8], index: 5, kind: input, shape index: {}]   ;;  %s1519_s6 = inlined_call_operand.vmem [shape: f32[1,8], index: 6, kind: input, shape index: {}]   ;;  %s1520_s7 = inlined_call_operand.vmem [shape: f32[256,8], index: 7, kind: output, shape index: {}]  }
   0x1 LB: > { %s1018_s25 = sadd.s32 4294967295, %s1281_s24   ;;  %p1022_p0 = scmp.ge.s32.totalorder %s1281_s24, 1  ;;  %s1281_s24 = sphi %s1323_s24, %s17_s24  }
   0x2   : > { %p238_p1 = scmp.lt.s32.totalorder %s1281_s24, 3 }
   0x4   : > { %p239_p2 = pnand %p1022_p0, %p238_p1 }
   0x5   : > { %v298_v0 = vld [vmem:[%s1514_s1] sm:$0xff] (!%p239_p2)  ;;  %v299_v1 = vld [vmem:[%s1514_s1 + $0x8] sm:$0xff] (!%p239_p2)  ;;  %v300_v2 = vld [vmem:[%s1514_s1 + $0x10] sm:$0xff] (!%p239_p2)  ;;  %s1023_s9 = sshll.u32 (!%p239_p2), %s1018_s25, 4  ;;  %vm310_vm0 = vcmask (!%p239_p2), 326656   ;;  %vm531_vm1 = vcmask (!%p239_p2), 261120  }
   0x6   : > { %242 = sbr.rel (%p239_p2) target bundleno = 698 (0x2ba), region = 48  ;;  %v1239_v3 = vpack.c.bf16 (!%p239_p2), %v299_v1, %v298_v0  ;;  %v301_v4 = vld [vmem:[%s1514_s1 + $0x18] sm:$0xff] (!%p239_p2)  ;;  %p271_p3 = scmp.lt.s32.totalorder (!%p239_p2), %s1023_s9, 31  ;;  %v520_v5 = vld [vmem:[%s1516_s3] sm:$0xff] (!%p239_p2)  ;;  %v521_v7 = vld [vmem:[%s1516_s3 + $0x8] sm:$0xff] (!%p239_p2)  ;;  %vm945_vm2 = vcmask (!%p239_p2), 64512  }
   0x7   : > { %v1243_v6 = vpack.c.bf16 (!%p239_p2), %v301_v4, %v300_v2  ;;  %v522_v8 = vld [vmem:[%s1516_s3 + $0x10] sm:$0xff] (!%p239_p2)  ;;  %v523_v9 = vld [vmem:[%s1516_s3 + $0x18] sm:$0xff] (!%p239_p2)  ;;  %v1247_v10 = vpack.c.bf16 (!%p239_p2), %v521_v7, %v520_v5  ;;  %v302_v12 = vld [vmem:[%s1514_s1 + $0x20] sm:$0xff] (!%p239_p2) }
   0x8   : > { %1240 = vmatprep.subr.bf16.mxu0 (!%p239_p2), %v1239_v3  ;;  %v1251_v11 = vpack.c.bf16 (!%p239_p2), %v523_v9, %v522_v8  ;;  %v741_v29 = vld [vmem:[%s1518_s5] sm:$0xff] (!%p239_p2)  ;;  %v742_v30 = vld [vmem:[%s1518_s5 + $0x8] sm:$0xff] (!%p239_p2)  ;;  %v743_v55 = vld [vmem:[%s1518_s5 + $0x10] sm:$0xff] (!%p239_p2) }
   0x9   : > { %1242 = vmatpush3.bf16.msra.mxu0 (!%p239_p2), %v1239_v3  ;;  %1263 = vmatprep.subr.bf16.mxu1 (!%p239_p2), %v1247_v10  ;;  %v1255_v31 = vpack.c.bf16 (!%p239_p2), %v742_v30, %v741_v29  ;;  %v1409_v32 = vld [vmem:[%s1515_s2] ss:$0 sm:$0xff] (!%p239_p2)  ;;  %v744_v56 = vld [vmem:[%s1518_s5 + $0x18] sm:$0xff] (!%p239_p2) }
   0xa   : > { %1244 = vmatprep.subr.bf16.mxu0 (!%p239_p2), %v1243_v6  ;;  %1265 = vmatpush3.bf16.msra.mxu1 (!%p239_p2), %v1247_v10  ;;  %v1259_v62 = vpack.c.bf16 (!%p239_p2), %v744_v56, %v743_v55 }
   0xb   : > { %1264 = vmatprep.subr.bf16.mxu1 (!%p239_p2), %v1251_v11 }
   0xd   : > { %s1522_s9 = smov (!%p271_p3, %s1023_s9), 31  ;;  %1246 = vmatpush3.bf16.msra.mxu0 %v1243_v6 }
   0xe   : > { %s1024_s20 = sshll.u32 %s1522_s9, 3  ;;  %1149 = vmatprep.subr.mxu0 %v302_v12  ;;  %1266 = vmatpush3.bf16.msra.mxu1 %v1251_v11 }
   0xf   : > { %s1366_s26 = scalar_lea.vmem %s1513_s0, %s1024_s20  ;;  %1256 = vmatprep.subr.bf16.mxu1 %v1255_v31  ;;  %s1476_s22 = scalar_lea.vmem %s1520_s7, %s1024_s20 }
  0x10   : > { %v282_v13 = vld [vmem:[%s1366_s26] sm:$0xff]  ;;  %v283_v14 = vld [vmem:[%s1366_s26 + $0x8] sm:$0xff]  ;;  %v284_v15 = vld [vmem:[%s1366_s26 + $0x10] sm:$0xff] }
  0x11   : > { %1151 = vmatprep.mubr.msk.f32.mxu0 %vm310_vm0, %v282_v13  ;;  %1150 = vmatpush3.msra.mxu0 %v302_v12  ;;  %v285_v16 = vld [vmem:[%s1366_s26 + $0x18] sm:$0xff]  ;;  %v286_v17 = vld [vmem:[%s1366_s26 + $0x20] sm:$0xff]  ;;  %v287_v18 = vld [vmem:[%s1366_s26 + $0x28] sm:$0xff] }
  0x12   : > { %1152 = vmatmul.mubr.msk.f32.vlgmr.msra.gmra.mrb[0].mxu0 %vm310_vm0, %v283_v14  ;;  %1248 = vmatprep.subr.bf16.mxu0 %v1247_v10  ;;  %v288_v19 = vld [vmem:[%s1366_s26 + $0x30] sm:$0xff]  ;;  %v289_v20 = vld [vmem:[%s1366_s26 + $0x38] sm:$0xff]  ;;  %v290_v21 = vld [vmem:[%s1366_s26 + $0x40] sm:$0xff] }
  0x13   : > { %1154 = vmatprep.mubr.msk.f32.mxu0 %vm310_vm0, %v284_v15  ;;  %1250 = vmatpush3.bf16.msra.mxu0 %v1247_v10  ;;  %v291_v22 = vld [vmem:[%s1366_s26 + $0x48] sm:$0xff]  ;;  %v292_v23 = vld [vmem:[%s1366_s26 + $0x50] sm:$0xff]  ;;  %v293_v24 = vld [vmem:[%s1366_s26 + $0x58] sm:$0xff] }
  0x14   : > { %1252 = vmatprep.subr.bf16.mxu0 %v1251_v11  ;;  %v294_v25 = vld [vmem:[%s1366_s26 + $0x60] sm:$0xff]  ;;  %v295_v26 = vld [vmem:[%s1366_s26 + $0x68] sm:$0xff]  ;;  %v296_v27 = vld [vmem:[%s1366_s26 + $0x70] sm:$0xff] }
  0x15   : > { %v297_v28 = vld [vmem:[%s1366_s26 + $0x78] sm:$0xff] }
  0x16   : > { %1155 = vmatmul.mubr.msk.f32.gmra.mrb[2].mxu0 %vm310_vm0, %v285_v16 }
  0x17   : > { %1157 = vmatprep.mubr.msk.f32.mxu0 %vm310_vm0, %v286_v17  ;;  %1254 = vmatpush3.bf16.msra.mxu0 %v1251_v11 }
  0x1a   : > { %1158 = vmatmul.mubr.msk.f32.gmra.mrb[4].mxu0 %vm310_vm0, %v287_v18 }
  0x1b   : > { %1160 = vmatprep.mubr.msk.f32.mxu0 %vm310_vm0, %v288_v19 }
  0x1e   : > { %1161 = vmatmul.mubr.msk.f32.gmra.mrb[6].mxu0 %vm310_vm0, %v289_v20  ;;  %v1044_v20 = vld [vmem:[%s1517_s4] ss:$0 sm:$0xff] }
  0x1f   : > { %1163 = vmatprep.mubr.msk.f32.mxu0 %vm310_vm0, %v290_v21 }
  0x22   : > { %1164 = vmatmul.mubr.msk.f32.gmra.mrb[8].mxu0 %vm310_vm0, %v291_v22 }
  0x23   : > { %1166 = vmatprep.mubr.msk.f32.mxu0 %vm310_vm0, %v292_v23 }
  0x26   : > { %1167 = vmatmul.mubr.msk.f32.gmra.mrb[10].mxu0 %vm310_vm0, %v293_v24 }
  0x27   : > { %1169 = vmatprep.mubr.msk.f32.mxu0 %vm310_vm0, %v294_v25 }
  0x2a   : > { %1170 = vmatmul.mubr.msk.f32.gmra.mrb[12].mxu0 %vm310_vm0, %v295_v26 }
  0x2b   : > { %1172 = vmatprep.mubr.msk.f32.mxu0 %vm310_vm0, %v296_v27 }
  0x2e   : > { %1173 = vmatmul.mubr.msk.f32.gmra.mrb[14].mxu0 %vm310_vm0, %v297_v28 }
  0xe5   : > { %v1153_v33 = vpop.f32.mrb[0].mxu0 }
  0xe6   : > { %v431_v34 = vadd.f32 %v1153_v33, %v1409_v32  ;;  %v425_v35 = vpop.f32.mrb[1].mxu0 }
  0xe7   : > { %v426_v36 = vadd.f32 %v1409_v32, %v425_v35 }
  0xe8   : > { %v505_v39 = vmax.f32 %v431_v34, 0.0 }
  0xe9   : > { %v504_v37 = vmax.f32 %v426_v36, 0.0  ;;  %v1156_v38 = vpop.f32.mrb[2].mxu0 }
  0xea   : > { %v441_v40 = vadd.f32 %v1156_v38, %v1409_v32  ;;  %v435_v41 = vpop.f32.mrb[3].mxu0 }
  0xeb   : > { %v436_v42 = vadd.f32 %v1409_v32, %v435_v41  ;;  %1183 = vmatprep.mubr.msk.f32.mxu0 %vm531_vm1, %v504_v37 }
  0xec   : > { %1184 = vmatmul.mubr.msk.f32.vlgmr.msra.gmra.mrb[16].mxu0 %vm531_vm1, %v505_v39  ;;  %v507_v45 = vmax.f32 %v441_v40, 0.0 }
  0xed   : > { %v506_v43 = vmax.f32 %v436_v42, 0.0  ;;  %v1159_v44 = vpop.f32.mrb[4].mxu0 }
  0xee   : > { %v451_v46 = vadd.f32 %v1159_v44, %v1409_v32  ;;  %v445_v47 = vpop.f32.mrb[5].mxu0 }
  0xef   : > { %v446_v48 = vadd.f32 %v1409_v32, %v445_v47  ;;  %1186 = vmatprep.mubr.msk.f32.mxu0 %vm531_vm1, %v506_v43 }
  0xf0   : > { %1187 = vmatmul.mubr.msk.f32.gmra.mrb[18].mxu0 %vm531_vm1, %v507_v45  ;;  %v509_v51 = vmax.f32 %v451_v46, 0.0 }
  0xf1   : > { %v508_v49 = vmax.f32 %v446_v48, 0.0  ;;  %v1162_v50 = vpop.f32.mrb[6].mxu0 }
  0xf2   : > { %v461_v52 = vadd.f32 %v1162_v50, %v1409_v32  ;;  %v455_v53 = vpop.f32.mrb[7].mxu0 }
  0xf3   : > { %v456_v54 = vadd.f32 %v1409_v32, %v455_v53  ;;  %1189 = vmatprep.mubr.msk.f32.mxu0 %vm531_vm1, %v508_v49 }
  0xf4   : > { %1190 = vmatmul.mubr.msk.f32.gmra.mrb[20].mxu0 %vm531_vm1, %v509_v51  ;;  %v511_v59 = vmax.f32 %v461_v52, 0.0 }
  0xf5   : > { %v510_v57 = vmax.f32 %v456_v54, 0.0  ;;  %v1165_v58 = vpop.f32.mrb[8].mxu0 }
  0xf6   : > { %v471_v60 = vadd.f32 %v1165_v58, %v1409_v32  ;;  %v465_v61 = vpop.f32.mrb[9].mxu0 }
  0xf7   : > { %v466_v63 = vadd.f32 %v1409_v32, %v465_v61  ;;  %1192 = vmatprep.mubr.msk.f32.mxu1 %vm531_vm1, %v510_v57 }
  0xf8   : > { %1193 = vmatmul.mubr.msk.f32.vlgmr.msra.gmra.mrb[0].mxu1 %vm531_vm1, %v511_v59  ;;  %v513_v2 = vmax.f32 %v471_v60, 0.0 }
  0xf9   : > { %v512_v0 = vmax.f32 %v466_v63, 0.0  ;;  %v1168_v1 = vpop.f32.mrb[10].mxu0  ;;  %1258 = vmatpush3.bf16.msra.mxu1 %v1255_v31 }
  0xfa   : > { %v481_v3 = vadd.f32 %v1168_v1, %v1409_v32  ;;  %v475_v4 = vpop.f32.mrb[11].mxu0  ;;  %1260 = vmatprep.subr.bf16.mxu1 %v1259_v62 }
  0xfb   : > { %v476_v5 = vadd.f32 %v1409_v32, %v475_v4  ;;  %1195 = vmatprep.mubr.msk.f32.mxu1 %vm531_vm1, %v512_v0 }
  0xfc   : > { %1196 = vmatmul.mubr.msk.f32.gmra.mrb[2].mxu1 %vm531_vm1, %v513_v2  ;;  %v515_v8 = vmax.f32 %v481_v3, 0.0 }
  0xfd   : > { %v514_v6 = vmax.f32 %v476_v5, 0.0  ;;  %v1171_v7 = vpop.f32.mrb[12].mxu0  ;;  %1262 = vmatpush3.bf16.msra.mxu1 %v1259_v62  ;;  %v1061_v5 = vld [vmem:[%s1519_s6] ss:$0 sm:$0xff] }
  0xfe   : > { %v491_v9 = vadd.f32 %v1171_v7, %v1409_v32  ;;  %v485_v10 = vpop.f32.mrb[13].mxu0 }
  0xff   : > { %v486_v11 = vadd.f32 %v1409_v32, %v485_v10  ;;  %1198 = vmatprep.mubr.msk.f32.mxu1 %vm531_vm1, %v514_v6 }
 0x100   : > { %1199 = vmatmul.mubr.msk.f32.gmra.mrb[4].mxu1 %vm531_vm1, %v515_v8  ;;  %v517_v14 = vmax.f32 %v491_v9, 0.0 }
 0x101   : > { %v516_v12 = vmax.f32 %v486_v11, 0.0  ;;  %v1174_v13 = vpop.f32.mrb[14].mxu0 }
 0x102   : > { %v501_v15 = vadd.f32 %v1174_v13, %v1409_v32  ;;  %v495_v16 = vpop.f32.mrb[15].mxu0 }
 0x103   : > { %v496_v17 = vadd.f32 %v1409_v32, %v495_v16  ;;  %1201 = vmatprep.mubr.msk.f32.mxu1 %vm531_vm1, %v516_v12 }
 0x104   : > { %1202 = vmatmul.mubr.msk.f32.gmra.mrb[6].mxu1 %vm531_vm1, %v517_v14  ;;  %v519_v19 = vmax.f32 %v501_v15, 0.0 }
 0x105   : > { %v518_v18 = vmax.f32 %v496_v17, 0.0 }
 0x107   : > { %1204 = vmatprep.mubr.msk.f32.mxu1 %vm531_vm1, %v518_v18 }
 0x108   : > { %1205 = vmatmul.mubr.msk.f32.gmra.mrb[8].mxu1 %vm531_vm1, %v519_v19 }
 0x1bf   : > { %v1185_v21 = vpop.f32.mrb[16].mxu0 }
 0x1c0   : > { %v652_v22 = vadd.f32 %v1185_v21, %v1044_v20  ;;  %v646_v23 = vpop.f32.mrb[17].mxu0 }
 0x1c1   : > { %v647_v24 = vadd.f32 %v1044_v20, %v646_v23 }
 0x1c2   : > { %v726_v27 = vmax.f32 %v652_v22, 0.0 }
 0x1c3   : > { %v725_v25 = vmax.f32 %v647_v24, 0.0  ;;  %v1188_v26 = vpop.f32.mrb[18].mxu0 }
 0x1c4   : > { %v662_v28 = vadd.f32 %v1188_v26, %v1044_v20  ;;  %v656_v29 = vpop.f32.mrb[19].mxu0 }
 0x1c5   : > { %v657_v30 = vadd.f32 %v1044_v20, %v656_v29  ;;  %1215 = vmatprep.mubr.msk.f32.mxu1 %vm531_vm1, %v725_v25 }
 0x1c6   : > { %1216 = vmatmul.mubr.msk.f32.vlgmr.msra.gmra.mrb[10].mxu1 %vm531_vm1, %v726_v27  ;;  %v728_v33 = vmax.f32 %v662_v28, 0.0 }
 0x1c7   : > { %v727_v31 = vmax.f32 %v657_v30, 0.0  ;;  %v1191_v32 = vpop.f32.mrb[20].mxu0 }
 0x1c8   : > { %v672_v34 = vadd.f32 %v1191_v32, %v1044_v20  ;;  %v666_v35 = vpop.f32.mrb[21].mxu0 }
 0x1c9   : > { %v667_v36 = vadd.f32 %v1044_v20, %v666_v35  ;;  %1218 = vmatprep.mubr.msk.f32.mxu1 %vm531_vm1, %v727_v31 }
 0x1ca   : > { %1219 = vmatmul.mubr.msk.f32.gmra.mrb[12].mxu1 %vm531_vm1, %v728_v33  ;;  %v730_v39 = vmax.f32 %v672_v34, 0.0 }
 0x1cb   : > { %v729_v37 = vmax.f32 %v667_v36, 0.0  ;;  %v1194_v38 = vpop.f32.mrb[0].mxu1 }
 0x1cc   : > { %v682_v40 = vadd.f32 %v1194_v38, %v1044_v20  ;;  %v676_v41 = vpop.f32.mrb[1].mxu1 }
 0x1cd   : > { %v677_v42 = vadd.f32 %v1044_v20, %v676_v41  ;;  %1221 = vmatprep.mubr.msk.f32.mxu1 %vm531_vm1, %v729_v37 }
 0x1ce   : > { %1222 = vmatmul.mubr.msk.f32.gmra.mrb[14].mxu1 %vm531_vm1, %v730_v39  ;;  %v732_v45 = vmax.f32 %v682_v40, 0.0 }
 0x1cf   : > { %v731_v43 = vmax.f32 %v677_v42, 0.0  ;;  %v1197_v44 = vpop.f32.mrb[2].mxu1 }
 0x1d0   : > { %v692_v46 = vadd.f32 %v1197_v44, %v1044_v20  ;;  %v686_v47 = vpop.f32.mrb[3].mxu1 }
 0x1d1   : > { %v687_v48 = vadd.f32 %v1044_v20, %v686_v47  ;;  %1224 = vmatprep.mubr.msk.f32.mxu1 %vm531_vm1, %v731_v43 }
 0x1d2   : > { %1225 = vmatmul.mubr.msk.f32.gmra.mrb[16].mxu1 %vm531_vm1, %v732_v45  ;;  %v734_v51 = vmax.f32 %v692_v46, 0.0 }
 0x1d3   : > { %v733_v49 = vmax.f32 %v687_v48, 0.0  ;;  %v1200_v50 = vpop.f32.mrb[4].mxu1 }
 0x1d4   : > { %v702_v52 = vadd.f32 %v1200_v50, %v1044_v20  ;;  %v696_v53 = vpop.f32.mrb[5].mxu1 }
 0x1d5   : > { %v697_v54 = vadd.f32 %v1044_v20, %v696_v53  ;;  %1227 = vmatprep.mubr.msk.f32.mxu1 %vm531_vm1, %v733_v49 }
 0x1d6   : > { %1228 = vmatmul.mubr.msk.f32.gmra.mrb[18].mxu1 %vm531_vm1, %v734_v51  ;;  %v736_v57 = vmax.f32 %v702_v52, 0.0 }
 0x1d7   : > { %v735_v55 = vmax.f32 %v697_v54, 0.0  ;;  %v1203_v56 = vpop.f32.mrb[6].mxu1 }
 0x1d8   : > { %v712_v58 = vadd.f32 %v1203_v56, %v1044_v20  ;;  %v706_v59 = vpop.f32.mrb[7].mxu1 }
 0x1d9   : > { %v707_v60 = vadd.f32 %v1044_v20, %v706_v59  ;;  %1230 = vmatprep.mubr.msk.f32.mxu1 %vm531_vm1, %v735_v55 }
 0x1da   : > { %1231 = vmatmul.mubr.msk.f32.gmra.mrb[20].mxu1 %vm531_vm1, %v736_v57  ;;  %v738_v63 = vmax.f32 %v712_v58, 0.0 }
 0x1db   : > { %v737_v61 = vmax.f32 %v707_v60, 0.0  ;;  %v1206_v62 = vpop.f32.mrb[8].mxu1 }
 0x1dc   : > { %v722_v0 = vadd.f32 %v1206_v62, %v1044_v20  ;;  %v716_v1 = vpop.f32.mrb[9].mxu1 }
 0x1dd   : > { %v717_v2 = vadd.f32 %v1044_v20, %v716_v1  ;;  %1233 = vmatprep.mubr.msk.f32.mxu1 %vm531_vm1, %v737_v61 }
 0x1de   : > { %1234 = vmatmul.mubr.msk.f32.gmra.mrb[22].mxu1 %vm531_vm1, %v738_v63  ;;  %v740_v4 = vmax.f32 %v722_v0, 0.0 }
 0x1df   : > { %v739_v3 = vmax.f32 %v717_v2, 0.0 }
 0x1e1   : > { %1236 = vmatprep.mubr.msk.f32.mxu1 %vm531_vm1, %v739_v3 }
 0x1e2   : > { %1237 = vmatmul.mubr.msk.f32.gmra.mrb[24].mxu1 %vm531_vm1, %v740_v4 }
 0x299   : > { %v1217_v6 = vpop.f32.mrb[10].mxu1 }
 0x29a   : > { %v872_v7 = vadd.f32 %v1217_v6, %v1061_v5  ;;  %v866_v8 = vpop.f32.mrb[11].mxu1 }
 0x29b   : > { %v867_v9 = vadd.f32 %v1061_v5, %v866_v8 }
 0x29c   : > { %947 = vst.msk [vmem:[%s1476_s22 + $0x8] sm:$0xff] %vm945_vm2, %v872_v7 }
 0x29d   : > { %946 = vst.msk [vmem:[%s1476_s22] sm:$0xff] %vm945_vm2, %v867_v9  ;;  %v1220_v10 = vpop.f32.mrb[12].mxu1 }
 0x29e   : > { %v882_v11 = vadd.f32 %v1220_v10, %v1061_v5  ;;  %v876_v12 = vpop.f32.mrb[13].mxu1 }
 0x29f   : > { %v877_v13 = vadd.f32 %v1061_v5, %v876_v12 }
 0x2a0   : > { %949 = vst.msk [vmem:[%s1476_s22 + $0x18] sm:$0xff] %vm945_vm2, %v882_v11 }
 0x2a1   : > { %948 = vst.msk [vmem:[%s1476_s22 + $0x10] sm:$0xff] %vm945_vm2, %v877_v13  ;;  %v1223_v14 = vpop.f32.mrb[14].mxu1 }
 0x2a2   : > { %v892_v15 = vadd.f32 %v1223_v14, %v1061_v5  ;;  %v886_v16 = vpop.f32.mrb[15].mxu1 }
 0x2a3   : > { %v887_v17 = vadd.f32 %v1061_v5, %v886_v16 }
 0x2a4   : > { %951 = vst.msk [vmem:[%s1476_s22 + $0x28] sm:$0xff] %vm945_vm2, %v892_v15 }
 0x2a5   : > { %950 = vst.msk [vmem:[%s1476_s22 + $0x20] sm:$0xff] %vm945_vm2, %v887_v17  ;;  %v1226_v18 = vpop.f32.mrb[16].mxu1 }
 0x2a6   : > { %v902_v19 = vadd.f32 %v1226_v18, %v1061_v5  ;;  %v896_v20 = vpop.f32.mrb[17].mxu1 }
 0x2a7   : > { %v897_v21 = vadd.f32 %v1061_v5, %v896_v20 }
 0x2a8   : > { %953 = vst.msk [vmem:[%s1476_s22 + $0x38] sm:$0xff] %vm945_vm2, %v902_v19 }
 0x2a9   : > { %952 = vst.msk [vmem:[%s1476_s22 + $0x30] sm:$0xff] %vm945_vm2, %v897_v21  ;;  %v1229_v22 = vpop.f32.mrb[18].mxu1 }
 0x2aa   : > { %v912_v23 = vadd.f32 %v1229_v22, %v1061_v5  ;;  %v906_v24 = vpop.f32.mrb[19].mxu1 }
 0x2ab   : > { %v907_v25 = vadd.f32 %v1061_v5, %v906_v24 }
 0x2ac   : > { %955 = vst.msk [vmem:[%s1476_s22 + $0x48] sm:$0xff] %vm945_vm2, %v912_v23 }
 0x2ad   : > { %954 = vst.msk [vmem:[%s1476_s22 + $0x40] sm:$0xff] %vm945_vm2, %v907_v25  ;;  %v1232_v26 = vpop.f32.mrb[20].mxu1 }
 0x2ae   : > { %v922_v27 = vadd.f32 %v1232_v26, %v1061_v5  ;;  %v916_v28 = vpop.f32.mrb[21].mxu1 }
 0x2af   : > { %v917_v29 = vadd.f32 %v1061_v5, %v916_v28 }
 0x2b0   : > { %957 = vst.msk [vmem:[%s1476_s22 + $0x58] sm:$0xff] %vm945_vm2, %v922_v27 }
 0x2b1   : > { %956 = vst.msk [vmem:[%s1476_s22 + $0x50] sm:$0xff] %vm945_vm2, %v917_v29  ;;  %v1235_v30 = vpop.f32.mrb[22].mxu1 }
 0x2b2   : > { %v932_v31 = vadd.f32 %v1235_v30, %v1061_v5  ;;  %v926_v32 = vpop.f32.mrb[23].mxu1 }
 0x2b3   : > { %v927_v33 = vadd.f32 %v1061_v5, %v926_v32 }
 0x2b4   : > { %959 = vst.msk [vmem:[%s1476_s22 + $0x68] sm:$0xff] %vm945_vm2, %v932_v31 }
 0x2b5   : > { %958 = vst.msk [vmem:[%s1476_s22 + $0x60] sm:$0xff] %vm945_vm2, %v927_v33  ;;  %v1238_v34 = vpop.f32.mrb[24].mxu1 }
 0x2b6   : > { %v942_v35 = vadd.f32 %v1238_v34, %v1061_v5  ;;  %v936_v36 = vpop.f32.mrb[25].mxu1 }
 0x2b7   : > { %v937_v37 = vadd.f32 %v1061_v5, %v936_v36 }
 0x2b8   : > { %961 = vst.msk [vmem:[%s1476_s22 + $0x78] sm:$0xff] %vm945_vm2, %v942_v35 }
 0x2b9   : > { %960 = vst.msk [vmem:[%s1476_s22 + $0x70] sm:$0xff] %vm945_vm2, %v937_v37 }
 0x2ba PF: > { %s17_s24 = sadd.s32 1, %s1281_s24  }
 0x2bb   : > { %p14_p4 = scmp.ge.s32.totalorder %s17_s24, 4  }
 0x2bd   :  { %16 = sbr.rel (!%p14_p4) target bundleno = 1 (0x1), region = 78 }

</bundles_post_ra>
